<compile_context>
chip_gen: v7x
topology: tpu7x:2x2x1
jax: 0.10.0
libtpu: 0.0.40
codegen_flags: <defaults>
</compile_context>

<pallas_src>
import functools

import jax
import jax.numpy as jnp
from jax.experimental import pallas as pl
from jax.experimental.pallas import tpu as pltpu


def _round_up(v: int, m: int) -> int:
    return ((v + m - 1) // m) * m


def _make_mvn_kernel(*, C, n_dists, multiplicity, with_mask):
    """Build the Pallas kernel body (all loop bounds are trace-time constants)."""

    def kernel(*refs):
        if with_mask:
            xg_ref, w2_ref, w1_ref, w0_ref, mask_ref, o_ref = refs
        else:
            xg_ref, w2_ref, w1_ref, w0_ref, o_ref = refs

        xg = xg_ref[...]          # (TN, C * n_dists), component-major: [a, d]
        w2 = w2_ref[...]          # (n_pairs, K)
        w1 = w1_ref[...]          # (C, K)

        # Lane-tile each coordinate a of the data to the K = multiplicity*n_dists lanes:
        #   xs[a][n, m*n_dists + d] = x[n, d*C + a]   (matches torch .repeat ordering)
        xs = []
        for a in range(C):
            xa_nd = xg[:, a * n_dists:(a + 1) * n_dists]                   # (TN, n_dists)
            xs.append(jnp.concatenate([xa_nd] * multiplicity, axis=-1))    # (TN, K)

        # logp = x^T W2 x + W1^T x + W0   (per lane k), pure VPU FMAs.
        acc = jnp.zeros(o_ref.shape, jnp.float32)
        idx = 0
        for a in range(C):
            for b in range(a, C):                       # symmetric quadratic: a <= b only
                acc = acc + (xs[a] * xs[b]) * w2[idx:idx + 1, :]
                idx += 1
        for a in range(C):
            acc = acc + xs[a] * w1[a:a + 1, :]
        acc = acc + w0_ref[...]                         # (1, K) broadcast over rows

        if with_mask:
            acc = acc * mask_ref[...]                   # fused Bernoulli dropout mask

        o_ref[...] = acc.astype(o_ref.dtype)

    return kernel


def mvn_forward(x, means, tril, *, cardinality, multiplicity, dropout=0.0,
                rng_key=None, block_rows=512):
    """Pallas equivalent of MultivariateNormal.forward.

    Args:
        x:      (N, in_features) float32.
        means:  (K, C) with K = multiplicity * n_dists, C = cardinality.
        tril:   (K, C, C) lower-triangular scale factors (positive diagonal).
        dropout: Bernoulli prob (mask is 1 with probability `dropout`, reference convention).
    Returns:
        (N, n_dists, multiplicity) float32 log-probabilities (optionally masked).
    """
    x = jnp.asarray(x, jnp.float32)
    N, F = x.shape
    C = int(cardinality)
    # TODO(synk): the reference's reflect-pad branch (in_features % cardinality != 0) is
    # not implemented (it pads the batch dim in the original code); require divisibility.
    assert F % C == 0, "in_features must be divisible by cardinality"
    n_dists = F // C
    K = int(multiplicity) * n_dists
    means = jnp.asarray(means, jnp.float32)
    tril = jnp.asarray(tril, jnp.float32)
    assert means.shape == (K, C) and tril.shape == (K, C, C)

    # ---- tiny parameter-side precompute (pure JAX, O(K*C^2)) ----
    eye = jnp.eye(C, dtype=jnp.float32)
    solve = functools.partial(jax.scipy.linalg.solve_triangular, lower=True)
    Linv = jax.vmap(lambda L: solve(L, eye))(tril)                  # (K, C, C)
    P = jnp.einsum('kca,kcb->kab', Linv, Linv)                      # Sigma^{-1}
    pairs = [(a, b) for a in range(C) for b in range(a, C)]
    W2 = jnp.stack([(-0.5 if a == b else -1.0) * P[:, a, b] for (a, b) in pairs],
                   axis=0)                                          # (n_pairs, K)
    W1 = jnp.einsum('kab,kb->ak', P, means)                         # (C, K)
    logdiag = jnp.log(jnp.diagonal(tril, axis1=-2, axis2=-1))       # (K, C)
    W0 = (-0.5 * jnp.einsum('ka,kab,kb->k', means, P, means)
          - 0.5 * C * jnp.log(2.0 * jnp.pi)
          - jnp.sum(logdiag, axis=-1))[None, :]                     # (1, K)

    # ---- lane-dense, component-major input layout: xg[n, a*n_dists + d] = x[n, d*C + a] ----
    xg = x.reshape(N, n_dists, C).transpose(0, 2, 1).reshape(N, C * n_dists)

    # ---- batch tiling (auto-pipelined grid, ~<=2 MiB blocks, v7x-safe VMEM budget) ----
    TN = min(int(block_rows), _round_up(N, 8))
    Npad = _round_up(N, TN)
    if Npad != N:
        xg = jnp.pad(xg, ((0, Npad - N), (0, 0)))

    use_mask = float(dropout) > 0.0
    inputs = [xg, W2, W1, W0]
    in_specs = [
        pl.BlockSpec((TN, C * n_dists), lambda i: (i, 0)),
        pl.BlockSpec((len(pairs), K), lambda i: (0, 0)),
        pl.BlockSpec((C, K), lambda i: (0, 0)),
        pl.BlockSpec((1, K), lambda i: (0, 0)),
    ]
    if use_mask:
        if rng_key is None:
            rng_key = jax.random.PRNGKey(0)
        # mask element is 1 with probability `dropout` (torchspn convention).
        mask = jax.random.bernoulli(rng_key, p=float(dropout),
                                    shape=(Npad, K)).astype(jnp.float32)
        inputs.append(mask)
        in_specs.append(pl.BlockSpec((TN, K), lambda i: (i, 0)))

    kernel = _make_mvn_kernel(C=C, n_dists=n_dists, multiplicity=int(multiplicity),
                              with_mask=use_mask)

    out = pl.pallas_call(
        kernel,
        out_shape=jax.ShapeDtypeStruct((Npad, K), jnp.float32),
        grid=(Npad // TN,),
        in_specs=in_specs,
        out_specs=pl.BlockSpec((TN, K), lambda i: (i, 0)),
        compiler_params=pltpu.CompilerParams(
            dimension_semantics=("parallel",),          # shard rows across TCs on v7x
            vmem_limit_bytes=32 * 1024 * 1024,
        ),
    )(*inputs)

    out = out[:N]                                       # drop batch padding
    return out.reshape(N, n_dists, int(multiplicity))


def mvn_forward_ref(x, means, tril, *, cardinality, multiplicity):
    """Pure-JAX mirror of the PyTorch forward (dropout=0 path), for validation."""
    x = jnp.asarray(x, jnp.float32)
    N, F = x.shape
    C = int(cardinality)
    n_dists = F // C
    xr = jnp.tile(x.reshape(N, n_dists, C), (1, int(multiplicity), 1))   # (N, K, C)
    diff = xr - means[None, :, :]
    eye = jnp.eye(C, dtype=jnp.float32)
    solve = functools.partial(jax.scipy.linalg.solve_triangular, lower=True)
    Linv = jax.vmap(lambda L: solve(L, eye))(tril)
    z = jnp.einsum('kab,nkb->nka', Linv, diff)
    quad = jnp.sum(z * z, axis=-1)
    logdet = jnp.sum(jnp.log(jnp.diagonal(tril, axis1=-2, axis2=-1)), axis=-1)
    logp = -0.5 * quad - 0.5 * C * jnp.log(2.0 * jnp.pi) - logdet[None, :]
    return logp.reshape(N, n_dists, int(multiplicity))


if __name__ == "__main__":
    key = jax.random.PRNGKey(0)
    k1, k2, k3, k4 = jax.random.split(key, 4)

    # MultivariateNormal(multiplicity=4, in_features=16, cardinality=2); batch of 2.
    N, in_features, cardinality, multiplicity = 2, 16, 2, 4
    n_dists = in_features // cardinality
    K = multiplicity * n_dists

    x = jax.random.normal(k1, (N, in_features), dtype=jnp.float32)
    means = jax.random.normal(k2, (K, cardinality), dtype=jnp.float32)
    # lower-triangular scale factors with positive diagonal (module uses rand().tril_();
    # diagonal shifted by +0.5 here purely for numerical conditioning of the demo data).
    rand = jax.random.uniform(k3, (K, cardinality, cardinality), dtype=jnp.float32)
    tril = jnp.tril(rand) + 0.5 * jnp.eye(cardinality, dtype=jnp.float32)[None]

    # Case 1: dropout = 0.0 (module default) -> plain MVN log-prob, checked vs pure-JAX ref.
    y0 = jax.block_until_ready(
        mvn_forward(x, means, tril, cardinality=cardinality,
                    multiplicity=multiplicity, dropout=0.0))
    y_ref = mvn_forward_ref(x, means, tril, cardinality=cardinality,
                            multiplicity=multiplicity)
    assert y0.shape == (N, n_dists, multiplicity) and y0.dtype == jnp.float32
    assert jnp.allclose(y0, y_ref, rtol=1e-3, atol=1e-3), "log_prob mismatch vs reference"

    # Case 2: dropout > 0.0 -> each element is either 0 or the dropout-free log-prob.
    y1 = jax.block_until_ready(
        mvn_forward(x, means, tril, cardinality=cardinality,
                    multiplicity=multiplicity, dropout=0.3, rng_key=k4))
    ok = jnp.isclose(y1, 0.0) | jnp.isclose(y1, y0, rtol=1e-5, atol=1e-5)
    assert bool(jnp.all(ok)), "dropout path must zero or pass through each element"

    print("KERNEL_OK")
</pallas_src>

<mosaic_0001>
module attributes {stable_mosaic.version = 11 : i64} {
  func.func @kernel(%arg0: i32, %arg1: memref<8x16xf32, #tpu.memory_space<vmem>>, %arg2: memref<3x32xf32, #tpu.memory_space<vmem>>, %arg3: memref<2x32xf32, #tpu.memory_space<vmem>>, %arg4: memref<1x32xf32, #tpu.memory_space<vmem>>, %arg5: memref<8x32xf32, #tpu.memory_space<vmem>>) attributes {dimension_semantics = [#tpu.dimension_semantics<parallel>], iteration_bounds = array<i64: 1>, scalar_prefetch = 0 : i64, scratch_operands = 0 : i64, tpu.core_type = #tpu.core_type<tc>, window_params = [{transform_indices = @transform_0, window_bounds = array<i64: 8, 16>}, {pipeline_mode = #tpu.pipeline_mode<synchronous>, transform_indices = @transform_1, window_bounds = array<i64: 3, 32>}, {pipeline_mode = #tpu.pipeline_mode<synchronous>, transform_indices = @transform_2, window_bounds = array<i64: 2, 32>}, {pipeline_mode = #tpu.pipeline_mode<synchronous>, transform_indices = @transform_3, window_bounds = array<i64: 1, 32>}, {transform_indices = @transform_4, window_bounds = array<i64: 8, 32>}]} {
    %c0 = arith.constant 0 : index
    %c0_0 = arith.constant 0 : index
    %0 = vector.load %arg1[%c0, %c0_0] : memref<8x16xf32, #tpu.memory_space<vmem>>, vector<8x16xf32>
    %c0_1 = arith.constant 0 : index
    %c0_2 = arith.constant 0 : index
    %1 = vector.load %arg2[%c0_1, %c0_2] : memref<3x32xf32, #tpu.memory_space<vmem>>, vector<3x32xf32>
    %c0_3 = arith.constant 0 : index
    %c0_4 = arith.constant 0 : index
    %2 = vector.load %arg3[%c0_3, %c0_4] : memref<2x32xf32, #tpu.memory_space<vmem>>, vector<2x32xf32>
    %3 = vector.extract_strided_slice %0 {offsets = [0, 0], sizes = [8, 8], strides = [1, 1]} : vector<8x16xf32> to vector<8x8xf32>
    %4 = tpu.concatenate %3, %3, %3, %3 in 1 : vector<8x8xf32>, vector<8x8xf32>, vector<8x8xf32>, vector<8x8xf32> -> vector<8x32xf32>
    %5 = vector.extract_strided_slice %0 {offsets = [0, 8], sizes = [8, 8], strides = [1, 1]} : vector<8x16xf32> to vector<8x8xf32>
    %6 = tpu.concatenate %5, %5, %5, %5 in 1 : vector<8x8xf32>, vector<8x8xf32>, vector<8x8xf32>, vector<8x8xf32> -> vector<8x32xf32>
    %cst = arith.constant 0.000000e+00 : f32
    %7 = vector.broadcast %cst : f32 to vector<8x32xf32>
    %8 = arith.mulf %4, %4 : vector<8x32xf32>
    %9 = vector.extract_strided_slice %1 {offsets = [0, 0], sizes = [1, 32], strides = [1, 1]} : vector<3x32xf32> to vector<1x32xf32>
    %10 = vector.broadcast %9 : vector<1x32xf32> to vector<8x32xf32>
    %11 = arith.mulf %8, %10 : vector<8x32xf32>
    %12 = arith.addf %7, %11 : vector<8x32xf32>
    %13 = arith.mulf %4, %6 : vector<8x32xf32>
    %14 = vector.extract_strided_slice %1 {offsets = [1, 0], sizes = [1, 32], strides = [1, 1]} : vector<3x32xf32> to vector<1x32xf32>
    %15 = vector.broadcast %14 : vector<1x32xf32> to vector<8x32xf32>
    %16 = arith.mulf %13, %15 : vector<8x32xf32>
    %17 = arith.addf %12, %16 : vector<8x32xf32>
    %18 = arith.mulf %6, %6 : vector<8x32xf32>
    %19 = vector.extract_strided_slice %1 {offsets = [2, 0], sizes = [1, 32], strides = [1, 1]} : vector<3x32xf32> to vector<1x32xf32>
    %20 = vector.broadcast %19 : vector<1x32xf32> to vector<8x32xf32>
    %21 = arith.mulf %18, %20 : vector<8x32xf32>
    %22 = arith.addf %17, %21 : vector<8x32xf32>
    %23 = vector.extract_strided_slice %2 {offsets = [0, 0], sizes = [1, 32], strides = [1, 1]} : vector<2x32xf32> to vector<1x32xf32>
    %24 = vector.broadcast %23 : vector<1x32xf32> to vector<8x32xf32>
    %25 = arith.mulf %4, %24 : vector<8x32xf32>
    %26 = arith.addf %22, %25 : vector<8x32xf32>
    %27 = vector.extract_strided_slice %2 {offsets = [1, 0], sizes = [1, 32], strides = [1, 1]} : vector<2x32xf32> to vector<1x32xf32>
    %28 = vector.broadcast %27 : vector<1x32xf32> to vector<8x32xf32>
    %29 = arith.mulf %6, %28 : vector<8x32xf32>
    %30 = arith.addf %26, %29 : vector<8x32xf32>
    %c0_5 = arith.constant 0 : index
    %c0_6 = arith.constant 0 : index
    %31 = vector.load %arg4[%c0_5, %c0_6] : memref<1x32xf32, #tpu.memory_space<vmem>>, vector<1x32xf32>
    %32 = vector.broadcast %31 : vector<1x32xf32> to vector<8x32xf32>
    %33 = arith.addf %30, %32 : vector<8x32xf32>
    %c0_7 = arith.constant 0 : index
    %c0_8 = arith.constant 0 : index
    %34 = vector.load %arg5[%c0_7, %c0_8] : memref<8x32xf32, #tpu.memory_space<vmem>>, vector<8x32xf32>
    tpu.vector_store %arg5[%c0_7, %c0_8], %33 {strides = array<i32>} : memref<8x32xf32, #tpu.memory_space<vmem>>, vector<8x32xf32>,
    return
  }
  func.func @transform_0(%arg0: i32) -> (i32, i32) {
    %c0_i32 = arith.constant 0 : i32
    %c0_i32_0 = arith.constant 0 : i32
    return %arg0, %c0_i32 : i32, i32
  }
  func.func @transform_1(%arg0: i32) -> (i32, i32) {
    %c0_i32 = arith.constant 0 : i32
    %c0_i32_0 = arith.constant 0 : i32
    %c0_i32_1 = arith.constant 0 : i32
    return %c0_i32, %c0_i32_0 : i32, i32
  }
  func.func @transform_2(%arg0: i32) -> (i32, i32) {
    %c0_i32 = arith.constant 0 : i32
    %c0_i32_0 = arith.constant 0 : i32
    %c0_i32_1 = arith.constant 0 : i32
    return %c0_i32, %c0_i32_0 : i32, i32
  }
  func.func @transform_3(%arg0: i32) -> (i32, i32) {
    %c0_i32 = arith.constant 0 : i32
    %c0_i32_0 = arith.constant 0 : i32
    %c0_i32_1 = arith.constant 0 : i32
    return %c0_i32, %c0_i32_0 : i32, i32
  }
  func.func @transform_4(%arg0: i32) -> (i32, i32) {
    %c0_i32 = arith.constant 0 : i32
    %c0_i32_0 = arith.constant 0 : i32
    return %arg0, %c0_i32 : i32, i32
  }
}

</mosaic_0001>

<bundles_post_ra>
// kernel: tpu_custom_call.1
= control target key start
LH: loop header
LB: loop body
LE: loop exit
PB: predicated region body
PF: predicated region fallthrough
CT: control target
= control target key end

     0   :  { %9 = vsyncpa [#allocation3], 0  ;;  %s280_s0 = inlined_call_operand.hbm [shape: f32[8,16], index: 0, kind: input, shape index: {}]   ;;  %s281_s1 = inlined_call_operand.hbm [shape: f32[3,32], index: 1, kind: input, shape index: {}]   ;;  %s282_s2 = inlined_call_operand.vmem [shape: f32[2,32], index: 2, kind: input, shape index: {}]   ;;  %s283_s3 = inlined_call_operand.vmem [shape: f32[1,32], index: 3, kind: input, shape index: {}]   ;;  %s284_s4 = inlined_call_operand.hbm [shape: f32[8,32], index: 4, kind: output, shape index: {}]  }
   0x1   :  { %10 = vsyncpa [#allocation6], 0 }
   0x2   :  { %11 = vsyncpa [#allocation4], 0  ;;  %s206_s15 = smov [#allocation2]   ;;  %s207_s17 = smov [#allocation5]  }
   0x3   :  { %s18_s16 = sshll.u32 %s206_s15, 4  ;;  %s28_s18 = sshll.u32 %s207_s17, 4  ;;  %s19_s16 = int_to_ptr.vmem [resolvable:$true] %s18_s16  ;;  %s29_s18 = int_to_ptr.vmem [resolvable:$true] %s28_s18 }
   0x4   :  { %s134_s21 = scalar_lea.hbm %s280_s0, 128 }
   0x5   :  { %p135_p0 = scmp.ne.s32.totalorder %s280_s0, %s134_s21  ;;  %p138_p1 = scmp.lt.u32.totalorder %s134_s21, %s280_s0 }
   0x7   :  { %p140_p2 = pnand %p138_p1, %p135_p0 }
   0x9   :  { %143 = shalt.err (!%p140_p2)
}
   0xa   :  { %s144_s26 = scalar_lea.vmem %s19_s16, 128  ;;  %p149_p4 = scmp.lt.s32.totalorder %s19_s16, %s19_s16 }
   0xb   :  { %p145_p3 = scmp.ne.s32.totalorder %s19_s16, %s144_s26  ;;  %p150_p5 = scmp.lt.s32.totalorder %s144_s26, %s144_s26 }
   0xd   :  { %p151_p6 = por %p150_p5, %p149_p4 }
   0xf   :  { %p152_p7 = pnand %p151_p6, %p145_p3 }
  0x11   :  { %155 = shalt.err (!%p152_p7)
}
  0x12   :  { %21 = dma.hbm_to_vmem [thread:$0]  %s280_s0, 128, %s19_s16, [#allocation3]  }
  0x13   :  { %s156_s5 = scalar_lea.hbm %s281_s1, 64 }
  0x14   :  { %p157_p8 = scmp.ne.s32.totalorder %s281_s1, %s156_s5  ;;  %p160_p9 = scmp.lt.u32.totalorder %s156_s5, %s281_s1 }
  0x16   :  { %p162_p10 = pnand %p160_p9, %p157_p8 }
  0x18   :  { %165 = shalt.err (!%p162_p10)
}
  0x19   :  { %s166_s10 = scalar_lea.vmem %s29_s18, 64  ;;  %p171_p12 = scmp.lt.s32.totalorder %s29_s18, %s29_s18 }
  0x1a   :  { %p167_p11 = scmp.ne.s32.totalorder %s29_s18, %s166_s10  ;;  %p172_p13 = scmp.lt.s32.totalorder %s166_s10, %s166_s10 }
  0x1c   :  { %p173_p0 = por %p172_p13, %p171_p12 }
  0x1e   :  { %p174_p1 = pnand %p173_p0, %p167_p11 }
  0x20   :  { %177 = shalt.err (!%p174_p1)
}
  0x21   :  { %31 = dma.hbm_to_vmem [thread:$0]  %s281_s1, 64, %s29_s18, [#allocation6]  }
  0x22   :  { %200 = dma.done.wait [#allocation3], 128  }
  0x23   :  { %201 = vsyncadd [#allocation3], 4294967168 }
  0x24   :  { %202 = dma.done.wait [#allocation6], 64  }
  0x25   :  { %203 = vsyncadd [#allocation6], 4294967232  ;;  %v42_v0 = vld [vmem:[#allocation2] sm:$0xff]  ;;  %s208_s12 = smov 16   ;;  %s209_s13 = smov 8   ;;  %v68_v1 = vlaneseq  ;;  %vm55_vm0 = vcmask 64512  }
  0x26   :  { %49 = vrot.lane.b32.xlu1 %v42_v0, %s208_s12  ;;  %46 = vrot.lane.b32.xlu0 %v42_v0, %s209_s13  ;;  %s210_s14 = smov 24   ;;  %s211_s15 = smov 120   ;;  %vm57_vm1 = vcmask 130048   ;;  %vm59_vm2 = vcmask 195584   ;;  %v43_v6 = vld [vmem:[#allocation5] sm:$0x7] }
  0x27   :  { %v69_v4 = vshrl.u32 %v68_v1, 7  ;;  %v44_v19 = vld [vmem:[%s282_s2] sm:$0x3]  ;;  %s212_s19 = smov [#allocation7]   ;;  %vm108_vm3 = vcmask 261120  }
  0x28   :  { %v126_v34 = vld [vmem:[%s283_s3] ss:$0 sm:$0xff]  ;;  %s116_s2 = sshll.u32 %s212_s19, 4  ;;  %s117_s2 = int_to_ptr.vmem [resolvable:$true] %s116_s2 }
  0x29   :  { %v70_v7 = vsub.s32 0, %v69_v4  ;;  %v77_v8 = vsub.s32 1, %v69_v4  ;;  %v84_v11 = vsub.s32 2, %v69_v4  ;;  %s178_s20 = scalar_lea.vmem %s117_s2, 128  ;;  %p183_p3 = scmp.lt.s32.totalorder %s117_s2, %s117_s2 }
  0x2a   :  { %52 = vrot.lane.b32.xlu1 %v42_v0, %s210_s14  ;;  %61 = vrot.lane.b32.xlu0 %v42_v0, %s211_s15  ;;  %p179_p2 = scmp.ne.s32.totalorder %s117_s2, %s178_s20  ;;  %p184_p4 = scmp.lt.s32.totalorder %s178_s20, %s178_s20 }
  0x2b   :  { %v71_v15 = vrot.slane %v43_v6, %v70_v7  ;;  %v78_v16 = vrot.slane %v43_v6, %v77_v8  ;;  %v85_v21 = vrot.slane %v43_v6, %v84_v11  ;;  %v91_v24 = vrot.slane %v44_v19, %v70_v7 }
  0x2c   :  { %v97_v27 = vrot.slane %v44_v19, %v77_v8  ;;  %p185_p5 = por %p184_p4, %p183_p3 }
  0x2e   :  { %p186_p6 = pnand %p185_p5, %p179_p2 }
  0x98   :  { %v50_v2 = vpop.permute.xlu1 %49  ;;  %v47_v3 = vpop.permute.xlu0 %46 }
  0x99   :  { %v56_v5 = vsel %vm55_vm0, %v42_v0, %v47_v3 }
  0x9a   :  { %v58_v10 = vsel %vm57_vm1, %v56_v5, %v50_v2 }
  0x9c   :  { %v53_v9 = vpop.permute.xlu1 %52  ;;  %v62_v12 = vpop.permute.xlu0 %61 }
  0x9d   :  { %v60_v13 = vsel %vm59_vm2, %v58_v10, %v53_v9  ;;  %v64_v14 = vsel %vm55_vm0, %v62_v12, %v42_v0 }
  0x9e   :  { %v67_v17 = vmul.f32 %v60_v13, %v60_v13  ;;  %v65_v18 = vsel %vm57_vm1, %v64_v14, %v47_v3  ;;  %v92_v30 = vmul.f32 %v91_v24, %v60_v13 }
  0x9f   :  { %v66_v20 = vsel %vm59_vm2, %v65_v18, %v50_v2 }
  0xa0   :  { %v74_v22 = vmul.f32 %v66_v20, %v60_v13  ;;  %v81_v23 = vmul.f32 %v66_v20, %v66_v20  ;;  %v72_v25 = vmul.f32 %v71_v15, %v67_v17  ;;  %v98_v32 = vmul.f32 %v97_v27, %v66_v20 }
  0xa2   :  { %v79_v26 = vmul.f32 %v78_v16, %v74_v22  ;;  %v86_v29 = vmul.f32 %v85_v21, %v81_v23 }
  0xa4   :  { %v80_v28 = vadd.f32 %v79_v26, %v72_v25 }
  0xa6   :  { %v87_v31 = vadd.f32 %v86_v29, %v80_v28 }
  0xa8   :  { %v93_v33 = vadd.f32 %v92_v30, %v87_v31 }
  0xaa   :  { %v99_v35 = vadd.f32 %v98_v32, %v93_v33 }
  0xac   :  { %v107_v36 = vadd.f32 %v126_v34, %v99_v35 }
  0xae   :  { %109 = vst.msk [vmem:[#allocation7] sm:$0xff] %vm108_vm3, %v107_v36 }
  0xaf   :  { %189 = shalt.err (!%p186_p6)
}
  0xb0   :  { %s190_s23 = scalar_lea.hbm %s284_s4, 128 }
  0xb1   :  { %p191_p7 = scmp.ne.s32.totalorder %s284_s4, %s190_s23  ;;  %p194_p8 = scmp.lt.u32.totalorder %s190_s23, %s284_s4 }
  0xb3   :  { %p196_p9 = pnand %p194_p8, %p191_p7 }
  0xb5   :  { %199 = shalt.err (!%p196_p9)
}
  0xb6   :  { %119 = dma.vmem_to_hbm [thread:$0]  %s117_s2, 128, %s284_s4, [#allocation4]  }
  0xb7   :  { %204 = dma.done.wait [#allocation4], 128  }
  0xb8   :  { %205 = vsyncadd [#allocation4], 4294967168 }
  0xb9   :  { %123 = vsyncpa [#allocation3], 1 }
  0xba   :  { %124 = vsyncpa [#allocation6], 1 }
  0xbb   :  { %125 = vsyncpa [#allocation4], 1 }

</bundles_post_ra>
